<compile_context>
chip_gen: v5e
topology: v5e:2x2
jax: 0.10.0
libtpu: 0.0.40
codegen_flags: <defaults>
</compile_context>

<pallas_src>
import functools

import jax
import jax.numpy as jnp
from jax.experimental import pallas as pl
from jax.experimental.pallas import tpu as pltpu

IN_DIM = 64
HID_DIM = 32
OUT_DIM = 2
DROPOUT_P = 0.3

# 4096 rows/tile: 4096*64*4 B = 1 MiB input per buffer (x2 for double-buffer)
# plus <1 MiB intermediates -> comfortably inside every generation's default
# scoped VMEM, including v7x's 64 MiB physical / 32 MiB default limit.
TILE_N_MAX = 4096


def _round_up(x: int, m: int) -> int:
    return ((x + m - 1) // m) * m


# --------------------------------------------------------------------------
# Kernels
# --------------------------------------------------------------------------
def _eval_kernel(x_ref, w_ref, b_ref, o_ref):
    # Folded single linear: [T, 64] @ [64, 2] + [1, 2]
    out = jnp.dot(x_ref[...], w_ref[...], preferred_element_type=jnp.float32)
    o_ref[...] = (out + b_ref[...]).astype(o_ref.dtype)


def _train_kernel(x_ref, w1_ref, b1_ref, w2_ref, b2_ref, mask_ref, o_ref):
    # First linear: [T, 64] @ [64, 32] + [1, 32]
    h = jnp.dot(x_ref[...], w1_ref[...], preferred_element_type=jnp.float32)
    h = h + b1_ref[...]
    # Inverted dropout: mask is 0 where dropped, 1/(1-p) where kept,
    # generated in the wrapper and tiled with the batch (per-tile unique).
    # TODO(synk): switch to the on-chip PRNG (pltpu.prng_seed + program_id mix)
    # once the interpret/CPU path supports it; host-side jax.random is used now.
    h = h * mask_ref[...]
    # Second linear: [T, 32] @ [32, 2] + [1, 2]
    out = jnp.dot(h, w2_ref[...], preferred_element_type=jnp.float32)
    o_ref[...] = (out + b2_ref[...]).astype(o_ref.dtype)


# --------------------------------------------------------------------------
# Wrapper
# --------------------------------------------------------------------------
def discriminator_forward(x, params, *, training: bool = False,
                          dropout_mask=None, rng=None):
    """x: [N, 64] float32 -> [N, 2] float32.

    training=False : Dropout is identity (PyTorch .eval()); the two linears are
                     folded into a single matmul.
    training=True  : Dropout(p=0.3) applied to the hidden layer via a scaled
                     keep-mask.  Pass `dropout_mask` ([N, 32], 0 or 1/(1-p)) or
                     an `rng` key to derive one.
    """
    n = x.shape[0]
    w1, b1, w2, b2 = params

    tile_n = min(TILE_N_MAX, _round_up(n, 8))
    n_pad = _round_up(n, tile_n)
    if n_pad != n:
        x = jnp.pad(x, ((0, n_pad - n), (0, 0)))
    grid = (pl.cdiv(n_pad, tile_n),)

    compiler_params = pltpu.CompilerParams(
        dimension_semantics=("parallel",))  # v7x: shard batch tiles across TCs

    if not training:
        # Fold the two linears (exact: dropout is identity in eval).
        w = jnp.dot(w1, w2)                 # [64, 2]
        b = jnp.dot(b1, w2) + b2            # [1, 2]
        out = pl.pallas_call(
            _eval_kernel,
            out_shape=jax.ShapeDtypeStruct((n_pad, OUT_DIM), jnp.float32),
            grid=grid,
            in_specs=[
                pl.BlockSpec((tile_n, IN_DIM), lambda i: (i, 0)),   # x tile
                pl.BlockSpec((IN_DIM, OUT_DIM), lambda i: (0, 0)),  # folded W
                pl.BlockSpec((1, OUT_DIM), lambda i: (0, 0)),       # folded b
            ],
            out_specs=pl.BlockSpec((tile_n, OUT_DIM), lambda i: (i, 0)),
            compiler_params=compiler_params,
        )(x, w, b)
    else:
        if dropout_mask is None:
            if rng is None:
                rng = jax.random.PRNGKey(0)
            keep = jax.random.bernoulli(rng, 1.0 - DROPOUT_P, (n, HID_DIM))
            dropout_mask = keep.astype(jnp.float32) * (1.0 / (1.0 - DROPOUT_P))
        mask = dropout_mask.astype(jnp.float32)
        if n_pad != n:
            mask = jnp.pad(mask, ((0, n_pad - n), (0, 0)))
        out = pl.pallas_call(
            _train_kernel,
            out_shape=jax.ShapeDtypeStruct((n_pad, OUT_DIM), jnp.float32),
            grid=grid,
            in_specs=[
                pl.BlockSpec((tile_n, IN_DIM), lambda i: (i, 0)),    # x tile
                pl.BlockSpec((IN_DIM, HID_DIM), lambda i: (0, 0)),   # w1
                pl.BlockSpec((1, HID_DIM), lambda i: (0, 0)),        # b1
                pl.BlockSpec((HID_DIM, OUT_DIM), lambda i: (0, 0)),  # w2
                pl.BlockSpec((1, OUT_DIM), lambda i: (0, 0)),        # b2
                pl.BlockSpec((tile_n, HID_DIM), lambda i: (i, 0)),   # mask tile
            ],
            out_specs=pl.BlockSpec((tile_n, OUT_DIM), lambda i: (i, 0)),
            compiler_params=compiler_params,
        )(x, w1, b1, w2, b2, mask)

    return out[:n]


def init_params(key):
    """Deterministic init mimicking PyTorch nn.Linear (uniform +/- 1/sqrt(fan_in))."""
    k1, k2, k3, k4 = jax.random.split(key, 4)
    bound1 = 1.0 / (IN_DIM ** 0.5)
    bound2 = 1.0 / (HID_DIM ** 0.5)
    # Stored as [in, out] so the kernel uses x @ W (== x @ W_pt.T).
    w1 = jax.random.uniform(k1, (IN_DIM, HID_DIM), jnp.float32, -bound1, bound1)
    b1 = jax.random.uniform(k2, (1, HID_DIM), jnp.float32, -bound1, bound1)
    w2 = jax.random.uniform(k3, (HID_DIM, OUT_DIM), jnp.float32, -bound2, bound2)
    b2 = jax.random.uniform(k4, (1, OUT_DIM), jnp.float32, -bound2, bound2)
    return w1, b1, w2, b2


if __name__ == "__main__":
    key = jax.random.PRNGKey(0)
    pkey, xkey, mkey = jax.random.split(key, 3)

    params = init_params(pkey)
    batch = 8
    x = jax.random.normal(xkey, (batch, IN_DIM), dtype=jnp.float32)
    w1, b1, w2, b2 = params

    # ---- Eval-mode forward (dropout == identity), deterministic. ----
    out = discriminator_forward(x, params, training=False)
    jax.block_until_ready(out)
    ref = (x @ w1 + b1) @ w2 + b2
    assert out.shape == (batch, OUT_DIM)
    assert jnp.allclose(out, ref, atol=1e-5, rtol=1e-5)

    # ---- Training-mode forward (dropout active via scaled keep-mask). ----
    keep = jax.random.bernoulli(mkey, 1.0 - DROPOUT_P, (batch, HID_DIM))
    mask = keep.astype(jnp.float32) * (1.0 / (1.0 - DROPOUT_P))
    out_train = discriminator_forward(x, params, training=True,
                                      dropout_mask=mask)
    jax.block_until_ready(out_train)
    ref_train = ((x @ w1 + b1) * mask) @ w2 + b2
    assert out_train.shape == (batch, OUT_DIM)
    assert jnp.allclose(out_train, ref_train, atol=1e-5, rtol=1e-5)

    print("KERNEL_OK")
</pallas_src>

<mosaic_0001>
module attributes {stable_mosaic.version = 11 : i64} {
  func.func @_eval_kernel(%arg0: i32, %arg1: memref<8x64xf32, #tpu.memory_space<vmem>>, %arg2: memref<64x2xf32, #tpu.memory_space<vmem>>, %arg3: memref<1x2xf32, #tpu.memory_space<vmem>>, %arg4: memref<8x2xf32, #tpu.memory_space<vmem>>) attributes {dimension_semantics = [#tpu.dimension_semantics<parallel>], iteration_bounds = array<i64: 1>, scalar_prefetch = 0 : i64, scratch_operands = 0 : i64, tpu.core_type = #tpu.core_type<tc>, window_params = [{transform_indices = @transform_0, window_bounds = array<i64: 8, 64>}, {pipeline_mode = #tpu.pipeline_mode<synchronous>, transform_indices = @transform_1, window_bounds = array<i64: 64, 2>}, {pipeline_mode = #tpu.pipeline_mode<synchronous>, transform_indices = @transform_2, window_bounds = array<i64: 1, 2>}, {transform_indices = @transform_3, window_bounds = array<i64: 8, 2>}]} {
    %c0 = arith.constant 0 : index
    %c0_0 = arith.constant 0 : index
    %0 = vector.load %arg1[%c0, %c0_0] : memref<8x64xf32, #tpu.memory_space<vmem>>, vector<8x64xf32>
    %c0_1 = arith.constant 0 : index
    %c0_2 = arith.constant 0 : index
    %1 = vector.load %arg2[%c0_1, %c0_2] : memref<64x2xf32, #tpu.memory_space<vmem>>, vector<64x2xf32>
    %cst = arith.constant dense<0.000000e+00> : vector<8x2xf32>
    %2 = tpu.matmul %0, %1, %cst {dimension_numbers = #tpu.dot_dimension_numbers<[1], [0], [0], [1], [0, 0, 1, 1], [], []>} : vector<8x64xf32>, vector<64x2xf32>, vector<8x2xf32> -> vector<8x2xf32>
    %c0_3 = arith.constant 0 : index
    %c0_4 = arith.constant 0 : index
    %3 = vector.load %arg3[%c0_3, %c0_4] : memref<1x2xf32, #tpu.memory_space<vmem>>, vector<1x2xf32>
    %4 = vector.broadcast %3 : vector<1x2xf32> to vector<8x2xf32>
    %5 = arith.addf %2, %4 : vector<8x2xf32>
    %c0_5 = arith.constant 0 : index
    %c0_6 = arith.constant 0 : index
    %6 = vector.load %arg4[%c0_5, %c0_6] : memref<8x2xf32, #tpu.memory_space<vmem>>, vector<8x2xf32>
    tpu.vector_store %arg4[%c0_5, %c0_6], %5 {strides = array<i32>} : memref<8x2xf32, #tpu.memory_space<vmem>>, vector<8x2xf32>,
    return
  }
  func.func @transform_0(%arg0: i32) -> (i32, i32) {
    %c0_i32 = arith.constant 0 : i32
    %c0_i32_0 = arith.constant 0 : i32
    return %arg0, %c0_i32 : i32, i32
  }
  func.func @transform_1(%arg0: i32) -> (i32, i32) {
    %c0_i32 = arith.constant 0 : i32
    %c0_i32_0 = arith.constant 0 : i32
    %c0_i32_1 = arith.constant 0 : i32
    return %c0_i32, %c0_i32_0 : i32, i32
  }
  func.func @transform_2(%arg0: i32) -> (i32, i32) {
    %c0_i32 = arith.constant 0 : i32
    %c0_i32_0 = arith.constant 0 : i32
    %c0_i32_1 = arith.constant 0 : i32
    return %c0_i32, %c0_i32_0 : i32, i32
  }
  func.func @transform_3(%arg0: i32) -> (i32, i32) {
    %c0_i32 = arith.constant 0 : i32
    %c0_i32_0 = arith.constant 0 : i32
    return %arg0, %c0_i32 : i32, i32
  }
}

</mosaic_0001>

<bundles_post_ra>
// kernel: tpu_custom_call.1
= control target key start
LH: loop header
LB: loop body
LE: loop exit
PB: predicated region body
PF: predicated region fallthrough
CT: control target
= control target key end

     0   :  { %vm27_vm0 = vcmask 523264   ;;  %vm51_vm1 = vcmask 15360   ;;  %s112_s1 = inlined_call_operand.vmem [shape: f32[64,2], index: 1, kind: input, shape index: {}]   ;;  %s113_s2 = inlined_call_operand.vmem [shape: f32[1,2], index: 2, kind: input, shape index: {}]   ;;  %s114_s0 = inlined_call_operand.vmem [shape: f32[8,64], index: 0, kind: input, shape index: {}]   ;;  %s115_s3 = inlined_call_operand.vmem [shape: f32[8,2], index: 3, kind: output, shape index: {}]  }
   0x1   :  { %v22_v0 = vld [vmem:[%s112_s1 + $0x38] sm:$0xff]  ;;  %v21_v1 = vld [vmem:[%s112_s1 + $0x30] sm:$0xff]  ;;  %v20_v2 = vld [vmem:[%s112_s1 + $0x28] sm:$0xff] }
   0x2   :  { %39 = vmatpush.msra.mxu0 %v22_v0  ;;  %v19_v3 = vld [vmem:[%s112_s1 + $0x20] sm:$0xff]  ;;  %v18_v4 = vld [vmem:[%s112_s1 + $0x18] sm:$0xff]  ;;  %v17_v5 = vld [vmem:[%s112_s1 + $0x10] sm:$0xff] }
   0x3   :  { %v16_v6 = vld [vmem:[%s112_s1 + $0x8] sm:$0xff]  ;;  %v15_v7 = vld [vmem:[%s112_s1] sm:$0xff] }
   0x4   :  { %40 = vmatpush.msra.mxu0 %v21_v1  ;;  %v14_v8 = vld [vmem:[%s114_s0] sm:$0xff] }
   0x5   :  { %v58_v9 = vld [vmem:[%s113_s2] ss:$0 sm:$0xff] }
   0x6   :  { %41 = vmatpush.msra.mxu0 %v20_v2 }
   0x8   :  { %42 = vmatpush.msra.mxu0 %v19_v3 }
   0xa   :  { %43 = vmatpush.msra.mxu0 %v18_v4 }
   0xc   :  { %44 = vmatpush.msra.mxu0 %v17_v5 }
   0xe   :  { %45 = vmatpush.msra.mxu0 %v16_v6 }
  0x10   :  { %46 = vmatpush.msra.mxu0 %v15_v7 }
  0x11   :  { %57 = vmatmul.msk.f32.vlgmr.msra.gmra.mxu0 %vm27_vm0, %v14_v8 }
  0x8e   :  { %v48_v10 = vpop.f32.mrf.mxu0 }
  0x8f   :  { %v49_v11 = vadd.f32 %v58_v9, %v48_v10 }
  0x91   :  { %52 = vst.msk [vmem:[%s115_s3] sm:$0xff] %vm51_vm1, %v49_v11 }

</bundles_post_ra>
